<compile_context>
chip_gen: v6e
topology: v6e:2x2x1
jax: 0.10.0
libtpu: 0.0.40
codegen_flags: <defaults>
</compile_context>

<pallas_src>
import jax
import jax.numpy as jnp
from jax.experimental import pallas as pl
from jax.experimental.pallas import tpu as pltpu


def rnn_kernel(x_ref, h0_ref, w_ih_ref, w_hh_ref, b_ref, out_ref):
    """Whole-sequence Elman RNN in one kernel invocation.

    x_ref   : (T*B, D)  inputs, time-major, batch flattened into rows
    h0_ref  : (B, H)    initial hidden state
    w_ih_ref: (D, H)    input->hidden weights (pre-transposed)
    w_hh_ref: (H, H)    hidden->hidden weights (pre-transposed)
    b_ref   : (1, H)    fused bias (b_ih + b_hh)
    out_ref : (T*B, H)  all hidden states, time-major, batch flattened
    """
    TB, H = out_ref.shape
    B = h0_ref.shape[0]
    T = TB // B

    # Phase 1: hoist the input projection off the serial dependency chain.
    # One MXU matmul covering all T timesteps + the (hoisted) bias broadcast.
    # Kept as a value (~2 vregs) -- no VMEM scratch round-trip.
    xw = (
        jnp.dot(x_ref[...], w_ih_ref[...], preferred_element_type=jnp.float32)
        + b_ref[...]
    )

    # Phase 2: the recurrence. T is a small static trip count, so fully unroll;
    # the hidden state and the per-step outputs stay in vector registers.
    w_hh = w_hh_ref[...]
    h = h0_ref[...]
    outs = []
    for t in range(T):
        h = jnp.tanh(
            xw[t * B:(t + 1) * B, :]
            + jnp.dot(h, w_hh, preferred_element_type=jnp.float32)
        )
        outs.append(h)

    # Single bulk store of all T hidden states (one (T*B, H) slab) instead of
    # T masked sub-tile stores.
    out_ref[...] = jnp.concatenate(outs, axis=0).astype(out_ref.dtype)


def my_rnn_forward(x, h0, w_ih, w_hh, b_ih, b_hh):
    """x: (T, B, D) f32, h0: (1, B, H) f32.
    w_ih: (H, D), w_hh: (H, H), b_ih/b_hh: (H,) — PyTorch parameter shapes.
    Returns (output, hidden) matching torch.nn.RNN."""
    T, B, D = x.shape
    H = w_ih.shape[0]

    x2 = x.reshape(T * B, D).astype(jnp.float32)          # (T*B, D)
    w_ih_t = jnp.transpose(w_ih).astype(jnp.float32)      # (D, H)
    w_hh_t = jnp.transpose(w_hh).astype(jnp.float32)      # (H, H)
    bias = (b_ih + b_hh).reshape(1, H).astype(jnp.float32)
    h0_2d = h0.reshape(B, H).astype(jnp.float32)

    vmem = pl.BlockSpec(memory_space=pltpu.MemorySpace.VMEM)
    out_flat = pl.pallas_call(
        rnn_kernel,
        out_shape=jax.ShapeDtypeStruct((T * B, H), jnp.float32),
        in_specs=[vmem, vmem, vmem, vmem, vmem],
        out_specs=vmem,
    )(x2, h0_2d, w_ih_t, w_hh_t, bias)

    out = out_flat.reshape(T, B, H)   # free row-major reshape in the wrapper
    hn = out[T - 1:T]                 # (1, B, H): final hidden state == out[-1:]
    return out, hn


def rnn_reference(x, h0, w_ih, w_hh, b_ih, b_hh):
    """Pure-JAX reference (mirrors torch.nn.RNN forward)."""
    def step(h, x_t):
        h_new = jnp.tanh(x_t @ w_ih.T + b_ih + h @ w_hh.T + b_hh)
        return h_new, h_new
    h_final, outs = jax.lax.scan(step, h0[0], x)
    return outs, h_final[None]


if __name__ == "__main__":
    # Small shapes consistent with the module: seq=8, batch=2, input=16, hidden=32.
    T, B, D, H = 8, 2, 16, 32

    key = jax.random.PRNGKey(0)
    k_x, k_h, k1, k2, k3, k4 = jax.random.split(key, 6)

    # Deterministic parameter init, PyTorch-style U(-1/sqrt(H), 1/sqrt(H)).
    bound = 1.0 / (H ** 0.5)
    w_ih = jax.random.uniform(k1, (H, D), jnp.float32, -bound, bound)
    w_hh = jax.random.uniform(k2, (H, H), jnp.float32, -bound, bound)
    b_ih = jax.random.uniform(k3, (H,), jnp.float32, -bound, bound)
    b_hh = jax.random.uniform(k4, (H,), jnp.float32, -bound, bound)

    x = jax.random.normal(k_x, (T, B, D), jnp.float32)
    h0 = jnp.zeros((1, B, H), jnp.float32)   # matches initHidden()

    out, hn = my_rnn_forward(x, h0, w_ih, w_hh, b_ih, b_hh)
    out = jax.block_until_ready(out)
    hn = jax.block_until_ready(hn)

    ref_out, ref_hn = rnn_reference(x, h0, w_ih, w_hh, b_ih, b_hh)
    assert out.shape == (T, B, H) and hn.shape == (1, B, H)
    assert jnp.allclose(out, ref_out, atol=1e-5, rtol=1e-5)
    assert jnp.allclose(hn, ref_hn, atol=1e-5, rtol=1e-5)

    print("KERNEL_OK")
</pallas_src>

<mosaic_0001>
module attributes {stable_mosaic.version = 11 : i64} {
  func.func @rnn_kernel(%arg0: memref<16x16xf32, #tpu.memory_space<vmem>>, %arg1: memref<2x32xf32, #tpu.memory_space<vmem>>, %arg2: memref<16x32xf32, #tpu.memory_space<vmem>>, %arg3: memref<32x32xf32, #tpu.memory_space<vmem>>, %arg4: memref<1x32xf32, #tpu.memory_space<vmem>>, %arg5: memref<16x32xf32, #tpu.memory_space<vmem>>) attributes {dimension_semantics = [], scalar_prefetch = 0 : i64, scratch_operands = 0 : i64, tpu.core_type = #tpu.core_type<tc>} {
    %c0 = arith.constant 0 : index
    %c0_0 = arith.constant 0 : index
    %0 = vector.load %arg0[%c0, %c0_0] : memref<16x16xf32, #tpu.memory_space<vmem>>, vector<16x16xf32>
    %c0_1 = arith.constant 0 : index
    %c0_2 = arith.constant 0 : index
    %1 = vector.load %arg2[%c0_1, %c0_2] : memref<16x32xf32, #tpu.memory_space<vmem>>, vector<16x32xf32>
    %cst = arith.constant dense<0.000000e+00> : vector<16x32xf32>
    %2 = tpu.matmul %0, %1, %cst {dimension_numbers = #tpu.dot_dimension_numbers<[1], [0], [0], [1], [0, 0, 1, 1], [], []>} : vector<16x16xf32>, vector<16x32xf32>, vector<16x32xf32> -> vector<16x32xf32>
    %c0_3 = arith.constant 0 : index
    %c0_4 = arith.constant 0 : index
    %3 = vector.load %arg4[%c0_3, %c0_4] : memref<1x32xf32, #tpu.memory_space<vmem>>, vector<1x32xf32>
    %4 = vector.broadcast %3 : vector<1x32xf32> to vector<16x32xf32>
    %5 = arith.addf %2, %4 : vector<16x32xf32>
    %c0_5 = arith.constant 0 : index
    %c0_6 = arith.constant 0 : index
    %6 = vector.load %arg3[%c0_5, %c0_6] : memref<32x32xf32, #tpu.memory_space<vmem>>, vector<32x32xf32>
    %c0_7 = arith.constant 0 : index
    %c0_8 = arith.constant 0 : index
    %7 = vector.load %arg1[%c0_7, %c0_8] : memref<2x32xf32, #tpu.memory_space<vmem>>, vector<2x32xf32>
    %8 = vector.extract_strided_slice %5 {offsets = [0, 0], sizes = [2, 32], strides = [1, 1]} : vector<16x32xf32> to vector<2x32xf32>
    %cst_9 = arith.constant dense<0.000000e+00> : vector<2x32xf32>
    %9 = tpu.matmul %7, %6, %cst_9 {dimension_numbers = #tpu.dot_dimension_numbers<[1], [0], [0], [1], [0, 0, 1, 1], [], []>} : vector<2x32xf32>, vector<32x32xf32>, vector<2x32xf32> -> vector<2x32xf32>
    %10 = arith.addf %8, %9 : vector<2x32xf32>
    %11 = math.tanh %10 : vector<2x32xf32>
    %12 = vector.extract_strided_slice %5 {offsets = [2, 0], sizes = [2, 32], strides = [1, 1]} : vector<16x32xf32> to vector<2x32xf32>
    %cst_10 = arith.constant dense<0.000000e+00> : vector<2x32xf32>
    %13 = tpu.matmul %11, %6, %cst_10 {dimension_numbers = #tpu.dot_dimension_numbers<[1], [0], [0], [1], [0, 0, 1, 1], [], []>} : vector<2x32xf32>, vector<32x32xf32>, vector<2x32xf32> -> vector<2x32xf32>
    %14 = arith.addf %12, %13 : vector<2x32xf32>
    %15 = math.tanh %14 : vector<2x32xf32>
    %16 = vector.extract_strided_slice %5 {offsets = [4, 0], sizes = [2, 32], strides = [1, 1]} : vector<16x32xf32> to vector<2x32xf32>
    %cst_11 = arith.constant dense<0.000000e+00> : vector<2x32xf32>
    %17 = tpu.matmul %15, %6, %cst_11 {dimension_numbers = #tpu.dot_dimension_numbers<[1], [0], [0], [1], [0, 0, 1, 1], [], []>} : vector<2x32xf32>, vector<32x32xf32>, vector<2x32xf32> -> vector<2x32xf32>
    %18 = arith.addf %16, %17 : vector<2x32xf32>
    %19 = math.tanh %18 : vector<2x32xf32>
    %20 = vector.extract_strided_slice %5 {offsets = [6, 0], sizes = [2, 32], strides = [1, 1]} : vector<16x32xf32> to vector<2x32xf32>
    %cst_12 = arith.constant dense<0.000000e+00> : vector<2x32xf32>
    %21 = tpu.matmul %19, %6, %cst_12 {dimension_numbers = #tpu.dot_dimension_numbers<[1], [0], [0], [1], [0, 0, 1, 1], [], []>} : vector<2x32xf32>, vector<32x32xf32>, vector<2x32xf32> -> vector<2x32xf32>
    %22 = arith.addf %20, %21 : vector<2x32xf32>
    %23 = math.tanh %22 : vector<2x32xf32>
    %24 = vector.extract_strided_slice %5 {offsets = [8, 0], sizes = [2, 32], strides = [1, 1]} : vector<16x32xf32> to vector<2x32xf32>
    %cst_13 = arith.constant dense<0.000000e+00> : vector<2x32xf32>
    %25 = tpu.matmul %23, %6, %cst_13 {dimension_numbers = #tpu.dot_dimension_numbers<[1], [0], [0], [1], [0, 0, 1, 1], [], []>} : vector<2x32xf32>, vector<32x32xf32>, vector<2x32xf32> -> vector<2x32xf32>
    %26 = arith.addf %24, %25 : vector<2x32xf32>
    %27 = math.tanh %26 : vector<2x32xf32>
    %28 = vector.extract_strided_slice %5 {offsets = [10, 0], sizes = [2, 32], strides = [1, 1]} : vector<16x32xf32> to vector<2x32xf32>
    %cst_14 = arith.constant dense<0.000000e+00> : vector<2x32xf32>
    %29 = tpu.matmul %27, %6, %cst_14 {dimension_numbers = #tpu.dot_dimension_numbers<[1], [0], [0], [1], [0, 0, 1, 1], [], []>} : vector<2x32xf32>, vector<32x32xf32>, vector<2x32xf32> -> vector<2x32xf32>
    %30 = arith.addf %28, %29 : vector<2x32xf32>
    %31 = math.tanh %30 : vector<2x32xf32>
    %32 = vector.extract_strided_slice %5 {offsets = [12, 0], sizes = [2, 32], strides = [1, 1]} : vector<16x32xf32> to vector<2x32xf32>
    %cst_15 = arith.constant dense<0.000000e+00> : vector<2x32xf32>
    %33 = tpu.matmul %31, %6, %cst_15 {dimension_numbers = #tpu.dot_dimension_numbers<[1], [0], [0], [1], [0, 0, 1, 1], [], []>} : vector<2x32xf32>, vector<32x32xf32>, vector<2x32xf32> -> vector<2x32xf32>
    %34 = arith.addf %32, %33 : vector<2x32xf32>
    %35 = math.tanh %34 : vector<2x32xf32>
    %36 = vector.extract_strided_slice %5 {offsets = [14, 0], sizes = [2, 32], strides = [1, 1]} : vector<16x32xf32> to vector<2x32xf32>
    %cst_16 = arith.constant dense<0.000000e+00> : vector<2x32xf32>
    %37 = tpu.matmul %35, %6, %cst_16 {dimension_numbers = #tpu.dot_dimension_numbers<[1], [0], [0], [1], [0, 0, 1, 1], [], []>} : vector<2x32xf32>, vector<32x32xf32>, vector<2x32xf32> -> vector<2x32xf32>
    %38 = arith.addf %36, %37 : vector<2x32xf32>
    %39 = math.tanh %38 : vector<2x32xf32>
    %40 = tpu.concatenate %11, %15, %19, %23, %27, %31, %35, %39 in 0 : vector<2x32xf32>, vector<2x32xf32>, vector<2x32xf32>, vector<2x32xf32>, vector<2x32xf32>, vector<2x32xf32>, vector<2x32xf32>, vector<2x32xf32> -> vector<16x32xf32>
    %c0_17 = arith.constant 0 : index
    %c0_18 = arith.constant 0 : index
    %41 = vector.load %arg5[%c0_17, %c0_18] : memref<16x32xf32, #tpu.memory_space<vmem>>, vector<16x32xf32>
    tpu.vector_store %arg5[%c0_17, %c0_18], %40 {strides = array<i32>} : memref<16x32xf32, #tpu.memory_space<vmem>>, vector<16x32xf32>,
    return
  }
}

</mosaic_0001>

<bundles_post_ra>
// kernel: tpu_custom_call.1
= control target key start
LH: loop header
LB: loop body
LE: loop exit
PB: predicated region body
PF: predicated region fallthrough
CT: control target
= control target key end

     0   :  { %10 = vsyncpa [#allocation3], 0  ;;  %s1288_s0 = inlined_call_operand.hbm [shape: f32[16,16], index: 0, kind: input, shape index: {}]   ;;  %s1289_s1 = inlined_call_operand.hbm [shape: f32[2,32], index: 1, kind: input, shape index: {}]   ;;  %s1290_s2 = inlined_call_operand.hbm [shape: f32[16,32], index: 2, kind: input, shape index: {}]   ;;  %s1291_s3 = inlined_call_operand.hbm [shape: f32[32,32], index: 3, kind: input, shape index: {}]   ;;  %s1292_s4 = inlined_call_operand.vmem [shape: f32[1,32], index: 4, kind: input, shape index: {}]   ;;  %s1293_s5 = inlined_call_operand.hbm [shape: f32[16,32], index: 5, kind: output, shape index: {}]  }
   0x1   :  { %11 = vsyncpa [#allocation6], 0 }
   0x2   :  { %12 = vsyncpa [#allocation9], 0 }
   0x3   :  { %13 = vsyncpa [#allocation4], 0  ;;  %s1109_s18 = smov [#allocation5]   ;;  %s1110_s20 = smov [#allocation2]  }
   0x4   :  { %s32_s19 = sshll.u32 %s1109_s18, 4  ;;  %s19_s21 = sshll.u32 %s1110_s20, 4  ;;  %s33_s19 = int_to_ptr.vmem [resolvable:$true] %s32_s19  ;;  %s20_s21 = int_to_ptr.vmem [resolvable:$true] %s19_s21 }
   0x5   :  { %s1009_s22 = scalar_lea.vmem %s33_s19, 32  ;;  %p1014_p1 = scmp.lt.s32.totalorder %s33_s19, %s33_s19 }
   0x6   :  { %p1010_p0 = scmp.ne.s32.totalorder %s33_s19, %s1009_s22  ;;  %p1015_p2 = scmp.lt.s32.totalorder %s1009_s22, %s1009_s22 }
   0x8   :  { %p1016_p3 = por %p1015_p2, %p1014_p1 }
   0xa   :  { %p1017_p4 = pnand %p1016_p3, %p1010_p0 }
   0xc   :  { %1020 = shalt.err (!%p1017_p4)
}
   0xd   :  { %35 = dma.hbm_to_vmem [thread:$0]  %s1289_s1, 32, %s33_s19, [#allocation6]  }
   0xe   :  { %s1029_s25 = scalar_lea.vmem %s20_s21, 256  ;;  %p1034_p6 = scmp.lt.s32.totalorder %s20_s21, %s20_s21 }
   0xf   :  { %p1030_p5 = scmp.ne.s32.totalorder %s20_s21, %s1029_s25  ;;  %p1035_p7 = scmp.lt.s32.totalorder %s1029_s25, %s1029_s25 }
  0x11   :  { %p1036_p8 = por %p1035_p7, %p1034_p6 }
  0x13   :  { %p1037_p9 = pnand %p1036_p8, %p1030_p5 }
  0x15   :  { %1040 = shalt.err (!%p1037_p9)
}
  0x16   :  { %s1111_s26 = smov 128   ;;  %s1112_s27 = smov 8  }
  0x17   :  { %25 = dma.hbm_to_vmem [thread:$0]  %s1288_s0, 256, %s20_s21, [#allocation3], %s1111_s26, %s1111_s26, %s1112_s27  }
  0x18   :  { %s1113_s30 = smov [#allocation7]   ;;  %s1114_s7 = smov [#allocation8]  }
  0x19   :  { %s41_s6 = sshll.u32 %s1113_s30, 4  ;;  %s53_s1 = sshll.u32 %s1114_s7, 4  ;;  %s42_s6 = int_to_ptr.vmem [resolvable:$true] %s41_s6  ;;  %s54_s1 = int_to_ptr.vmem [resolvable:$true] %s53_s1 }
  0x1a   :  { %s1049_s8 = scalar_lea.vmem %s42_s6, 256  ;;  %p1054_p11 = scmp.lt.s32.totalorder %s42_s6, %s42_s6 }
  0x1b   :  { %p1050_p10 = scmp.ne.s32.totalorder %s42_s6, %s1049_s8  ;;  %p1055_p12 = scmp.lt.s32.totalorder %s1049_s8, %s1049_s8 }
  0x1d   :  { %p1056_p13 = por %p1055_p12, %p1054_p11 }
  0x1f   :  { %p1057_p0 = pnand %p1056_p13, %p1050_p10 }
  0x21   :  { %1060 = shalt.err (!%p1057_p0)
}
  0x22   :  { %47 = dma.hbm_to_vmem [thread:$0]  %s1290_s2, 256, %s42_s6, [#allocation6], %s1111_s26, %s1111_s26, %s1112_s27  }
  0x23   :  { %s1069_s0 = scalar_lea.vmem %s54_s1, 512  ;;  %p1074_p2 = scmp.lt.s32.totalorder %s54_s1, %s54_s1 }
  0x24   :  { %p1070_p1 = scmp.ne.s32.totalorder %s54_s1, %s1069_s0  ;;  %p1075_p3 = scmp.lt.s32.totalorder %s1069_s0, %s1069_s0 }
  0x26   :  { %p1076_p4 = por %p1075_p3, %p1074_p2 }
  0x28   :  { %p1077_p5 = pnand %p1076_p4, %p1070_p1 }
  0x2a   :  { %1080 = shalt.err (!%p1077_p5)
}
  0x2b   :  { %59 = dma.hbm_to_vmem [thread:$0]  %s1291_s3, 512, %s54_s1, [#allocation9], %s1111_s26, %s1111_s26, %s1112_s27  }
  0x2c   :  { %1101 = dma.done.wait [#allocation3], 256  }
  0x2d   :  { %1102 = vsyncadd [#allocation3], 4294967040 }
  0x2e   :  { %1103 = dma.done.wait [#allocation6], 288  }
  0x2f   :  { %1104 = vsyncadd [#allocation6], 4294967008 }
  0x30   :  { %1105 = dma.done.wait [#allocation9], 512  }
  0x31   :  { %1106 = vsyncadd [#allocation9], 4294966784  ;;  %v1115_v0 = vmov 0.0   ;;  %vm1116_vm0 = vmmov 0   ;;  %v77_v1 = vld [vmem:[#allocation7 + $0x8] sm:$0xff]  ;;  %v76_v3 = vld [vmem:[#allocation7] sm:$0xff] }
  0x32   :  { %888 = vmatprep.subr.mxu1 %v1115_v0  ;;  %896 = vmatprep.mubr.msk.f32.mxu1 %vm1116_vm0, %v1115_v0  ;;  %v1172_v2 = vld [vmem:[#allocation8 + $0x18] sm:$0xff]  ;;  %v1175_v4 = vld [vmem:[#allocation8 + $0x10] sm:$0xff]  ;;  %vm85_vm1 = vcmask 130048   ;;  %v75_v6 = vld [vmem:[#allocation2 + $0x8] sm:$0xff]  ;;  %vm172_vm2 = vcmask 261120   ;;  %vm796_vm3 = vcmask 1041408  }
  0x33   :  { %881 = vmatprep.subr.mxu0 %v77_v1  ;;  %889 = vmatpush3.msra.mxu1 %v1172_v2  ;;  %v74_v5 = vld [vmem:[#allocation2] sm:$0xff]  ;;  %v1179_v7 = vld [vmem:[#allocation8 + $0x8] sm:$0xff]  ;;  %vm798_vm4 = vcmask 1043456   ;;  %vm800_vm5 = vcmask 1045504  }
  0x34   :  { %882 = vmatpush3.msra.mxu0 %v77_v1  ;;  %890 = vmatprep.subr.mxu1 %v1115_v0  ;;  %v1182_v8 = vld [vmem:[#allocation8] sm:$0xff]  ;;  %v171_v9 = vld [vmem:[#allocation5] sm:$0x3]  ;;  %v826_v10 = vld [vmem:[%s1292_s4] ss:$0 sm:$0xff]  ;;  %s1117_s4 = smov [#allocation10]  }
  0x35   :  { %883 = vmatprep.subr.mxu0 %v76_v3  ;;  %891 = vmatpush3.msra.mxu1 %v1175_v4  ;;  %s812_s13 = sshll.u32 %s1117_s4, 4  ;;  %s813_s13 = int_to_ptr.vmem [resolvable:$true] %s812_s13 }
  0x36   :  { %884 = vmatpush3.msra.mxu0 %v76_v3  ;;  %885 = vmatprep.mubr.msk.f32.mxu0 %vm85_vm1, %v74_v5  ;;  %s1081_s14 = scalar_lea.vmem %s813_s13, 256  ;;  %p1086_p7 = scmp.lt.s32.totalorder %s813_s13, %s813_s13 }
  0x37   :  { %892 = vmatprep.subr.mxu1 %v1115_v0  ;;  %886 = vmatmul.mubr.msk.f32.vlgmr.msra.gmra.mxu0 %vm85_vm1, %v75_v6  ;;  %p1082_p6 = scmp.ne.s32.totalorder %s813_s13, %s1081_s14  ;;  %p1087_p8 = scmp.lt.s32.totalorder %s1081_s14, %s1081_s14 }
  0x38   :  { %893 = vmatpush3.msra.mxu1 %v1179_v7  ;;  %899 = vmatprep.subr.mxu0 %v1115_v0 }
  0x39   :  { %894 = vmatprep.subr.mxu1 %v1115_v0  ;;  %900 = vmatpush3.msra.mxu0 %v1172_v2  ;;  %p1088_p9 = por %p1087_p8, %p1086_p7 }
  0x3a   :  { %895 = vmatpush3.msra.mxu1 %v1182_v8  ;;  %901 = vmatprep.subr.mxu0 %v1115_v0 }
  0x3b   :  { %897 = vmatmul.mubr.msk.f32.vlgmr.msra.gmra.mxu1 %vm172_vm2, %v171_v9  ;;  %902 = vmatpush3.msra.mxu0 %v1175_v4  ;;  %p1089_p10 = pnand %p1088_p9, %p1082_p6 }
  0x3c   :  { %903 = vmatprep.subr.mxu0 %v1115_v0  ;;  %907 = vmatprep.mubr.msk.f32.mxu0 %vm1116_vm0, %v1115_v0 }
  0x3d   :  { %904 = vmatpush3.msra.mxu0 %v1179_v7  ;;  %910 = vmatprep.subr.mxu1 %v1115_v0 }
  0x3e   :  { %905 = vmatprep.subr.mxu0 %v1115_v0  ;;  %911 = vmatpush3.msra.mxu1 %v1172_v2 }
  0x3f   :  { %906 = vmatpush3.msra.mxu0 %v1182_v8  ;;  %912 = vmatprep.subr.mxu1 %v1115_v0 }
  0x40   :  { %913 = vmatpush3.msra.mxu1 %v1175_v4  ;;  %918 = vmatprep.mubr.msk.f32.mxu1 %vm1116_vm0, %v1115_v0 }
  0x41   :  { %914 = vmatprep.subr.mxu1 %v1115_v0  ;;  %921 = vmatprep.subr.mxu0 %v1115_v0 }
  0x42   :  { %915 = vmatpush3.msra.mxu1 %v1179_v7 }
  0x43   :  { %916 = vmatprep.subr.mxu1 %v1115_v0 }
  0x44   :  { %917 = vmatpush3.msra.mxu1 %v1182_v8 }
  0x45   :  { %932 = vmatprep.subr.mxu1 %v1115_v0 }
  0xf7   :  { %v887_v11 = vpop.f32.mrf.mxu0 }
  0xf8   :  { %v1213_v12 = vadd.f32 %v887_v11, %v826_v10 }
  0xf9   :  { %v158_v13 = vpop.f32.mrf.mxu0 }
  0xfa   :  { %v159_v14 = vadd.f32 %v826_v10, %v158_v13 }
  0xfb   :  { %v242_v15 = vpop.f32.mrf.mxu1 }
  0xfc   :  { %v246_v16 = vadd.f32 %v242_v15, %v159_v14 }
  0xfd   :  { %v898_v17 = vpop.f32.mrf.mxu1 }
  0xfe   :  { %985 = vtanh.f32 %v246_v16 }
 0x10b   :  { %v986_v18 = vpop.eup %985 }
 0x10c   :  { %908 = vmatmul.mubr.msk.f32.vlgmr.msra.gmra.mxu0 %vm172_vm2, %v986_v18 }
 0x10d   :  { %922 = vmatpush3.msra.mxu0 %v1172_v2  ;;  %929 = vmatprep.mubr.msk.f32.mxu0 %vm1116_vm0, %v1115_v0 }
 0x10e   :  { %923 = vmatprep.subr.mxu0 %v1115_v0 }
 0x10f   :  { %924 = vmatpush3.msra.mxu0 %v1175_v4 }
 0x110   :  { %925 = vmatprep.subr.mxu0 %v1115_v0 }
 0x111   :  { %926 = vmatpush3.msra.mxu0 %v1179_v7 }
 0x112   :  { %927 = vmatprep.subr.mxu0 %v1115_v0 }
 0x113   :  { %928 = vmatpush3.msra.mxu0 %v1182_v8 }
 0x114   :  { %943 = vmatprep.subr.mxu0 %v1115_v0 }
 0x1cc   :  { %v317_v19 = vpop.f32.mrf.mxu0 }
 0x1cd   :  { %v322_v20 = vrot.slane %v317_v19, 6 }
 0x1ce   :  { %v909_v21 = vpop.f32.mrf.mxu0 }
 0x1cf   :  { %v324_v22 = vadd.f32 %v322_v20, %v159_v14 }
 0x1d1   :  { %987 = vtanh.f32 %v324_v22 }
 0x1de   :  { %v988_v23 = vpop.eup %987 }
 0x1df   :  { %v327_v24 = vrot.slane %v988_v23, 2  ;;  %v797_v30 = vsel %vm796_vm3, %v986_v18, %v988_v23 }
 0x1e1   :  { %919 = vmatmul.mubr.msk.f32.vlgmr.msra.gmra.mxu1 %vm172_vm2, %v327_v24 }
 0x1e2   :  { %933 = vmatpush3.msra.mxu1 %v1172_v2  ;;  %940 = vmatprep.mubr.msk.f32.mxu1 %vm1116_vm0, %v1115_v0 }
 0x1e3   :  { %934 = vmatprep.subr.mxu1 %v1115_v0 }
 0x1e4   :  { %935 = vmatpush3.msra.mxu1 %v1175_v4 }
 0x1e5   :  { %936 = vmatprep.subr.mxu1 %v1115_v0 }
 0x1e6   :  { %937 = vmatpush3.msra.mxu1 %v1179_v7 }
 0x1e7   :  { %938 = vmatprep.subr.mxu1 %v1115_v0 }
 0x1e8   :  { %939 = vmatpush3.msra.mxu1 %v1182_v8 }
 0x1e9   :  { %954 = vmatprep.subr.mxu1 %v1115_v0 }
 0x2a1   :  { %v396_v25 = vpop.f32.mrf.mxu1 }
 0x2a2   :  { %v401_v26 = vrot.slane %v396_v25, 4 }
 0x2a3   :  { %v920_v27 = vpop.f32.mrf.mxu1 }
 0x2a4   :  { %v403_v28 = vadd.f32 %v401_v26, %v159_v14 }
 0x2a6   :  { %989 = vtanh.f32 %v403_v28 }
 0x2b3   :  { %v990_v29 = vpop.eup %989 }
 0x2b4   :  { %v406_v31 = vrot.slane %v990_v29, 4  ;;  %v799_v32 = vsel %vm798_vm4, %v797_v30, %v990_v29 }
 0x2b6   :  { %930 = vmatmul.mubr.msk.f32.vlgmr.msra.gmra.mxu0 %vm172_vm2, %v406_v31 }
 0x2b7   :  { %944 = vmatpush3.msra.mxu0 %v1172_v2  ;;  %951 = vmatprep.mubr.msk.f32.mxu0 %vm1116_vm0, %v1115_v0 }
 0x2b8   :  { %945 = vmatprep.subr.mxu0 %v1115_v0 }
 0x2b9   :  { %946 = vmatpush3.msra.mxu0 %v1175_v4 }
 0x2ba   :  { %947 = vmatprep.subr.mxu0 %v1115_v0 }
 0x2bb   :  { %948 = vmatpush3.msra.mxu0 %v1179_v7 }
 0x2bc   :  { %949 = vmatprep.subr.mxu0 %v1115_v0 }
 0x2bd   :  { %950 = vmatpush3.msra.mxu0 %v1182_v8 }
 0x2be   :  { %965 = vmatprep.subr.mxu0 %v1115_v0 }
 0x376   :  { %v475_v33 = vpop.f32.mrf.mxu0 }
 0x377   :  { %v480_v34 = vrot.slane %v475_v33, 2 }
 0x378   :  { %v931_v35 = vpop.f32.mrf.mxu0 }
 0x379   :  { %v482_v36 = vadd.f32 %v480_v34, %v159_v14 }
 0x37b   :  { %991 = vtanh.f32 %v482_v36 }
 0x388   :  { %v992_v37 = vpop.eup %991 }
 0x389   :  { %v485_v38 = vrot.slane %v992_v37, 6  ;;  %v801_v39 = vsel %vm800_vm5, %v799_v32, %v992_v37 }
 0x38a   :  { %805 = vst.msk [vmem:[#allocation10] sm:$0xff] %vm172_vm2, %v801_v39 }
 0x38b   :  { %941 = vmatmul.mubr.msk.f32.vlgmr.msra.gmra.mxu1 %vm172_vm2, %v485_v38 }
 0x38c   :  { %955 = vmatpush3.msra.mxu1 %v1172_v2  ;;  %962 = vmatprep.mubr.msk.f32.mxu1 %vm1116_vm0, %v1115_v0 }
 0x38d   :  { %956 = vmatprep.subr.mxu1 %v1115_v0 }
 0x38e   :  { %957 = vmatpush3.msra.mxu1 %v1175_v4 }
 0x38f   :  { %958 = vmatprep.subr.mxu1 %v1115_v0 }
 0x390   :  { %959 = vmatpush3.msra.mxu1 %v1179_v7 }
 0x391   :  { %960 = vmatprep.subr.mxu1 %v1115_v0 }
 0x392   :  { %961 = vmatpush3.msra.mxu1 %v1182_v8 }
 0x44b   :  { %v554_v40 = vpop.f32.mrf.mxu1 }
 0x44c   :  { %v558_v41 = vadd.f32 %v554_v40, %v1213_v12 }
 0x44d   :  { %v942_v42 = vpop.f32.mrf.mxu1 }
 0x44e   :  { %993 = vtanh.f32 %v558_v41 }
 0x45b   :  { %v994_v43 = vpop.eup %993 }
 0x45c   :  { %952 = vmatmul.mubr.msk.f32.vlgmr.msra.gmra.mxu0 %vm172_vm2, %v994_v43 }
 0x45d   :  { %966 = vmatpush3.msra.mxu0 %v1172_v2  ;;  %973 = vmatprep.mubr.msk.f32.mxu0 %vm1116_vm0, %v1115_v0 }
 0x45e   :  { %967 = vmatprep.subr.mxu0 %v1115_v0 }
 0x45f   :  { %968 = vmatpush3.msra.mxu0 %v1175_v4 }
 0x460   :  { %969 = vmatprep.subr.mxu0 %v1115_v0 }
 0x461   :  { %970 = vmatpush3.msra.mxu0 %v1179_v7 }
 0x462   :  { %971 = vmatprep.subr.mxu0 %v1115_v0 }
 0x463   :  { %972 = vmatpush3.msra.mxu0 %v1182_v8 }
 0x51c   :  { %v629_v44 = vpop.f32.mrf.mxu0 }
 0x51d   :  { %v634_v45 = vrot.slane %v629_v44, 6 }
 0x51e   :  { %v953_v46 = vpop.f32.mrf.mxu0 }
 0x51f   :  { %v636_v47 = vadd.f32 %v634_v45, %v1213_v12 }
 0x521   :  { %995 = vtanh.f32 %v636_v47 }
 0x52e   :  { %v996_v48 = vpop.eup %995 }
 0x52f   :  { %v639_v49 = vrot.slane %v996_v48, 2  ;;  %v802_v55 = vsel %vm796_vm3, %v994_v43, %v996_v48 }
 0x531   :  { %963 = vmatmul.mubr.msk.f32.vlgmr.msra.gmra.mxu1 %vm172_vm2, %v639_v49 }
 0x5f1   :  { %v708_v50 = vpop.f32.mrf.mxu1 }
 0x5f2   :  { %v713_v51 = vrot.slane %v708_v50, 4 }
 0x5f3   :  { %v964_v52 = vpop.f32.mrf.mxu1 }
 0x5f4   :  { %v715_v53 = vadd.f32 %v713_v51, %v1213_v12 }
 0x5f6   :  { %997 = vtanh.f32 %v715_v53 }
 0x603   :  { %v998_v54 = vpop.eup %997 }
 0x604   :  { %v718_v56 = vrot.slane %v998_v54, 4  ;;  %v803_v57 = vsel %vm798_vm4, %v802_v55, %v998_v54 }
 0x606   :  { %974 = vmatmul.mubr.msk.f32.vlgmr.msra.gmra.mxu0 %vm172_vm2, %v718_v56 }
 0x6c6   :  { %v787_v58 = vpop.f32.mrf.mxu0 }
 0x6c7   :  { %v792_v59 = vrot.slane %v787_v58, 2 }
 0x6c8   :  { %v975_v60 = vpop.f32.mrf.mxu0 }
 0x6c9   :  { %v794_v61 = vadd.f32 %v792_v59, %v1213_v12 }
 0x6cb   :  { %999 = vtanh.f32 %v794_v61 }
 0x6d8   :  { %v1000_v62 = vpop.eup %999 }
 0x6d9   :  { %v804_v63 = vsel %vm800_vm5, %v803_v57, %v1000_v62 }
 0x6da   :  { %806 = vst.msk [vmem:[#allocation10 + $0x8] sm:$0xff] %vm172_vm2, %v804_v63 }
 0x6db   :  { %1092 = shalt.err (!%p1089_p10)
}
 0x6dc   :  { %818 = dma.vmem_to_hbm [thread:$0]  %s813_s13, 256, %s1293_s5, [#allocation4], %s1111_s26, %s1111_s26, %s1112_s27  }
 0x6dd   :  { %1107 = dma.done.wait [#allocation4], 256  }
 0x6de   :  { %1108 = vsyncadd [#allocation4], 4294967040 }
 0x6df   :  { %822 = vsyncpa [#allocation3], 1 }
 0x6e0   :  { %823 = vsyncpa [#allocation6], 1 }
 0x6e1   :  { %824 = vsyncpa [#allocation9], 1 }
 0x6e2   :  { %825 = vsyncpa [#allocation4], 1 }

</bundles_post_ra>
